<compile_context>
chip_gen: v5e
topology: v5e:2x2
jax: 0.10.0
libtpu: 0.0.40
codegen_flags: <defaults>
</compile_context>

<pallas_src>
import functools
import math

import jax
import jax.numpy as jnp
from jax import lax
from jax.experimental import pallas as pl
from jax.experimental.pallas import tpu as pltpu


def _mapping_kernel(x_ref, w_ref, b_ref, o_ref, *, n_fc, scale, leaky_slope,
                    compute_dtype):
    x = x_ref[...].astype(jnp.float32)

    # --- PixelNorm over the feature dim (lanes): x * rsqrt(mean(x^2)+1e-8) ---
    x = x * lax.rsqrt(jnp.mean(x * x, axis=-1, keepdims=True) + 1e-8)

    # --- n_fc x (scaled Linear + LeakyReLU(0.2)), statically unrolled ---
    for i in range(n_fc):
        w = w_ref[i]          # (D, D), (in, out) layout, VMEM-resident
        b = b_ref[i]          # (1, D)
        # (x @ (W*scale)) + b == (x @ W) * scale + b   (bias is NOT scaled)
        y = jnp.dot(x.astype(compute_dtype), w.astype(compute_dtype),
                    preferred_element_type=jnp.float32)
        y = y * scale + b.astype(jnp.float32)
        x = jnp.where(y >= 0.0, y, leaky_slope * y)   # LeakyReLU(0.2)

    o_ref[...] = x.astype(o_ref.dtype)


def _pick_block_b(B: int) -> int:
    """Batch tile: multiple of 8 (sublane-aligned) dividing B, else full B."""
    for tb in (512, 256, 128, 64, 32, 16, 8):
        if B % tb == 0:
            return tb
    return B  # block == full array extent is always a valid BlockSpec


def intermediate_generator(latent_z, weights, biases, *, block_b=None,
                           compute_dtype=jnp.float32):
    """latent_z: (B, D); weights: (n_fc, D, D) in (in, out) layout; biases: (n_fc, 1, D)."""
    B, D = latent_z.shape
    n_fc = weights.shape[0]
    assert weights.shape == (n_fc, D, D)
    assert biases.shape == (n_fc, 1, D)

    if block_b is None:
        block_b = _pick_block_b(B)
    assert B % block_b == 0, "block_b must divide B"
    grid = (B // block_b,)

    kernel = functools.partial(
        _mapping_kernel,
        n_fc=n_fc,
        scale=math.sqrt(2.0 / D),       # ScaleW: fan_in = dim_latent * 1
        leaky_slope=0.2,
        compute_dtype=compute_dtype,
    )

    # VMEM budget: resident weights/biases (x2 for the pipeline's second
    # buffer) + double-buffered (TB, D) in/out activation tiles + headroom.
    weight_bytes = n_fc * D * D * jnp.dtype(weights.dtype).itemsize
    bias_bytes = n_fc * D * jnp.dtype(biases.dtype).itemsize
    act_bytes = 2 * 2 * block_b * D * jnp.dtype(latent_z.dtype).itemsize
    vmem_limit = int(2 * (weight_bytes + bias_bytes) + act_bytes + (8 << 20))
    vmem_limit = max(16 << 20, min(vmem_limit, 60 << 20))  # safe on v7x (64 MiB)

    cost = pl.CostEstimate(
        flops=2 * B * D * D * n_fc,
        transcendentals=B,                                   # one rsqrt per row
        bytes_accessed=2 * B * D * jnp.dtype(latent_z.dtype).itemsize
        + weight_bytes + bias_bytes,
    )

    return pl.pallas_call(
        kernel,
        out_shape=jax.ShapeDtypeStruct((B, D), latent_z.dtype),
        grid=grid,
        in_specs=[
            pl.BlockSpec((block_b, D), lambda i: (i, 0)),
            pl.BlockSpec((n_fc, D, D), lambda i: (0, 0, 0)),   # VMEM-resident
            pl.BlockSpec((n_fc, 1, D), lambda i: (0, 0, 0)),   # VMEM-resident
        ],
        out_specs=pl.BlockSpec((block_b, D), lambda i: (i, 0)),
        compiler_params=pltpu.CompilerParams(
            dimension_semantics=("parallel",),
            vmem_limit_bytes=vmem_limit,
        ),
        cost_estimate=cost,
    )(latent_z, weights, biases)


def _reference(latent_z, weights, biases):
    """Pure-JAX reference matching the PyTorch forward semantics."""
    D = latent_z.shape[1]
    scale = math.sqrt(2.0 / D)
    x = latent_z.astype(jnp.float32)
    x = x / jnp.sqrt(jnp.mean(x * x, axis=1, keepdims=True) + 1e-8)
    for i in range(weights.shape[0]):
        y = x @ weights[i] * scale + biases[i]
        x = jnp.where(y >= 0.0, y, 0.2 * y)
    return x


if __name__ == "__main__":
    B = 2          # batch
    D = 32         # dim_latent
    N_FC = 4       # n_fc

    key = jax.random.PRNGKey(0)
    k_z, k_w = jax.random.split(key)

    latent_z = jax.random.normal(k_z, (B, D), dtype=jnp.float32)
    # nn.Linear weight.data.normal_() -> standard normal; bias.data.zero_()
    weights = jax.random.normal(k_w, (N_FC, D, D), dtype=jnp.float32)  # (in, out)
    biases = jnp.zeros((N_FC, 1, D), dtype=jnp.float32)

    out = intermediate_generator(latent_z, weights, biases)
    out = jax.block_until_ready(out)

    ref = _reference(latent_z, weights, biases)
    assert out.shape == (B, D)
    assert jnp.allclose(out, ref, atol=1e-5, rtol=1e-5), "mismatch vs JAX reference"

    print("KERNEL_OK")
</pallas_src>

<mosaic_0001>
module attributes {stable_mosaic.version = 11 : i64} {
  func.func @_mapping_kernel(%arg0: i32, %arg1: memref<2x32xf32, #tpu.memory_space<vmem>>, %arg2: memref<4x32x32xf32, #tpu.memory_space<vmem>>, %arg3: memref<4x1x32xf32, #tpu.memory_space<vmem>>, %arg4: memref<2x32xf32, #tpu.memory_space<vmem>>) attributes {dimension_semantics = [#tpu.dimension_semantics<parallel>], iteration_bounds = array<i64: 1>, scalar_prefetch = 0 : i64, scratch_operands = 0 : i64, tpu.core_type = #tpu.core_type<tc>, window_params = [{transform_indices = @transform_0, window_bounds = array<i64: 2, 32>}, {pipeline_mode = #tpu.pipeline_mode<synchronous>, transform_indices = @transform_1, window_bounds = array<i64: 4, 32, 32>}, {pipeline_mode = #tpu.pipeline_mode<synchronous>, transform_indices = @transform_2, window_bounds = array<i64: 4, 1, 32>}, {transform_indices = @transform_3, window_bounds = array<i64: 2, 32>}]} {
    %c0 = arith.constant 0 : index
    %c0_0 = arith.constant 0 : index
    %0 = vector.load %arg1[%c0, %c0_0] : memref<2x32xf32, #tpu.memory_space<vmem>>, vector<2x32xf32>
    %1 = arith.mulf %0, %0 : vector<2x32xf32>
    %cst = arith.constant dense<0.000000e+00> : vector<2xf32>
    %2 = vector.multi_reduction <add>, %1, %cst [1] : vector<2x32xf32> to vector<2xf32>
    %3 = vector.shape_cast %2 : vector<2xf32> to vector<2x1xf32>
    %cst_1 = arith.constant 3.200000e+01 : f32
    %4 = vector.broadcast %cst_1 : f32 to vector<2x1xf32>
    %5 = arith.divf %3, %4 : vector<2x1xf32>
    %cst_2 = arith.constant 9.99999993E-9 : f32
    %6 = vector.broadcast %cst_2 : f32 to vector<2x1xf32>
    %7 = arith.addf %5, %6 : vector<2x1xf32>
    %8 = math.rsqrt %7 : vector<2x1xf32>
    %9 = vector.broadcast %8 : vector<2x1xf32> to vector<2x32xf32>
    %10 = arith.mulf %0, %9 : vector<2x32xf32>
    %c0_3 = arith.constant 0 : index
    %c0_4 = arith.constant 0 : index
    %c0_5 = arith.constant 0 : index
    %11 = vector.load %arg2[%c0_3, %c0_4, %c0_5] : memref<4x32x32xf32, #tpu.memory_space<vmem>>, vector<1x32x32xf32>
    %12 = vector.shape_cast %11 : vector<1x32x32xf32> to vector<32x32xf32>
    %c0_6 = arith.constant 0 : index
    %c0_7 = arith.constant 0 : index
    %c0_8 = arith.constant 0 : index
    %13 = vector.load %arg3[%c0_6, %c0_7, %c0_8] : memref<4x1x32xf32, #tpu.memory_space<vmem>>, vector<1x1x32xf32>
    %14 = vector.shape_cast %13 : vector<1x1x32xf32> to vector<1x32xf32>
    %cst_9 = arith.constant dense<0.000000e+00> : vector<2x32xf32>
    %15 = tpu.matmul %10, %12, %cst_9 {dimension_numbers = #tpu.dot_dimension_numbers<[1], [0], [0], [1], [0, 0, 1, 1], [], []>} : vector<2x32xf32>, vector<32x32xf32>, vector<2x32xf32> -> vector<2x32xf32>
    %cst_10 = arith.constant 2.500000e-01 : f32
    %16 = vector.broadcast %cst_10 : f32 to vector<2x32xf32>
    %17 = arith.mulf %15, %16 : vector<2x32xf32>
    %18 = vector.broadcast %14 : vector<1x32xf32> to vector<2x32xf32>
    %19 = arith.addf %17, %18 : vector<2x32xf32>
    %cst_11 = arith.constant 0.000000e+00 : f32
    %20 = vector.broadcast %cst_11 : f32 to vector<2x32xf32>
    %21 = arith.cmpf oge, %19, %20 : vector<2x32xf32>
    %cst_12 = arith.constant 2.000000e-01 : f32
    %22 = vector.broadcast %cst_12 : f32 to vector<2x32xf32>
    %23 = arith.mulf %22, %19 : vector<2x32xf32>
    %24 = arith.select %21, %19, %23 : vector<2x32xi1>, vector<2x32xf32>
    %c1 = arith.constant 1 : index
    %c0_13 = arith.constant 0 : index
    %c0_14 = arith.constant 0 : index
    %25 = vector.load %arg2[%c1, %c0_13, %c0_14] : memref<4x32x32xf32, #tpu.memory_space<vmem>>, vector<1x32x32xf32>
    %26 = vector.shape_cast %25 : vector<1x32x32xf32> to vector<32x32xf32>
    %c1_15 = arith.constant 1 : index
    %c0_16 = arith.constant 0 : index
    %c0_17 = arith.constant 0 : index
    %27 = vector.load %arg3[%c1_15, %c0_16, %c0_17] : memref<4x1x32xf32, #tpu.memory_space<vmem>>, vector<1x1x32xf32>
    %28 = vector.shape_cast %27 : vector<1x1x32xf32> to vector<1x32xf32>
    %cst_18 = arith.constant dense<0.000000e+00> : vector<2x32xf32>
    %29 = tpu.matmul %24, %26, %cst_18 {dimension_numbers = #tpu.dot_dimension_numbers<[1], [0], [0], [1], [0, 0, 1, 1], [], []>} : vector<2x32xf32>, vector<32x32xf32>, vector<2x32xf32> -> vector<2x32xf32>
    %cst_19 = arith.constant 2.500000e-01 : f32
    %30 = vector.broadcast %cst_19 : f32 to vector<2x32xf32>
    %31 = arith.mulf %29, %30 : vector<2x32xf32>
    %32 = vector.broadcast %28 : vector<1x32xf32> to vector<2x32xf32>
    %33 = arith.addf %31, %32 : vector<2x32xf32>
    %cst_20 = arith.constant 0.000000e+00 : f32
    %34 = vector.broadcast %cst_20 : f32 to vector<2x32xf32>
    %35 = arith.cmpf oge, %33, %34 : vector<2x32xf32>
    %cst_21 = arith.constant 2.000000e-01 : f32
    %36 = vector.broadcast %cst_21 : f32 to vector<2x32xf32>
    %37 = arith.mulf %36, %33 : vector<2x32xf32>
    %38 = arith.select %35, %33, %37 : vector<2x32xi1>, vector<2x32xf32>
    %c2 = arith.constant 2 : index
    %c0_22 = arith.constant 0 : index
    %c0_23 = arith.constant 0 : index
    %39 = vector.load %arg2[%c2, %c0_22, %c0_23] : memref<4x32x32xf32, #tpu.memory_space<vmem>>, vector<1x32x32xf32>
    %40 = vector.shape_cast %39 : vector<1x32x32xf32> to vector<32x32xf32>
    %c2_24 = arith.constant 2 : index
    %c0_25 = arith.constant 0 : index
    %c0_26 = arith.constant 0 : index
    %41 = vector.load %arg3[%c2_24, %c0_25, %c0_26] : memref<4x1x32xf32, #tpu.memory_space<vmem>>, vector<1x1x32xf32>
    %42 = vector.shape_cast %41 : vector<1x1x32xf32> to vector<1x32xf32>
    %cst_27 = arith.constant dense<0.000000e+00> : vector<2x32xf32>
    %43 = tpu.matmul %38, %40, %cst_27 {dimension_numbers = #tpu.dot_dimension_numbers<[1], [0], [0], [1], [0, 0, 1, 1], [], []>} : vector<2x32xf32>, vector<32x32xf32>, vector<2x32xf32> -> vector<2x32xf32>
    %cst_28 = arith.constant 2.500000e-01 : f32
    %44 = vector.broadcast %cst_28 : f32 to vector<2x32xf32>
    %45 = arith.mulf %43, %44 : vector<2x32xf32>
    %46 = vector.broadcast %42 : vector<1x32xf32> to vector<2x32xf32>
    %47 = arith.addf %45, %46 : vector<2x32xf32>
    %cst_29 = arith.constant 0.000000e+00 : f32
    %48 = vector.broadcast %cst_29 : f32 to vector<2x32xf32>
    %49 = arith.cmpf oge, %47, %48 : vector<2x32xf32>
    %cst_30 = arith.constant 2.000000e-01 : f32
    %50 = vector.broadcast %cst_30 : f32 to vector<2x32xf32>
    %51 = arith.mulf %50, %47 : vector<2x32xf32>
    %52 = arith.select %49, %47, %51 : vector<2x32xi1>, vector<2x32xf32>
    %c3 = arith.constant 3 : index
    %c0_31 = arith.constant 0 : index
    %c0_32 = arith.constant 0 : index
    %53 = vector.load %arg2[%c3, %c0_31, %c0_32] : memref<4x32x32xf32, #tpu.memory_space<vmem>>, vector<1x32x32xf32>
    %54 = vector.shape_cast %53 : vector<1x32x32xf32> to vector<32x32xf32>
    %c3_33 = arith.constant 3 : index
    %c0_34 = arith.constant 0 : index
    %c0_35 = arith.constant 0 : index
    %55 = vector.load %arg3[%c3_33, %c0_34, %c0_35] : memref<4x1x32xf32, #tpu.memory_space<vmem>>, vector<1x1x32xf32>
    %56 = vector.shape_cast %55 : vector<1x1x32xf32> to vector<1x32xf32>
    %cst_36 = arith.constant dense<0.000000e+00> : vector<2x32xf32>
    %57 = tpu.matmul %52, %54, %cst_36 {dimension_numbers = #tpu.dot_dimension_numbers<[1], [0], [0], [1], [0, 0, 1, 1], [], []>} : vector<2x32xf32>, vector<32x32xf32>, vector<2x32xf32> -> vector<2x32xf32>
    %cst_37 = arith.constant 2.500000e-01 : f32
    %58 = vector.broadcast %cst_37 : f32 to vector<2x32xf32>
    %59 = arith.mulf %57, %58 : vector<2x32xf32>
    %60 = vector.broadcast %56 : vector<1x32xf32> to vector<2x32xf32>
    %61 = arith.addf %59, %60 : vector<2x32xf32>
    %cst_38 = arith.constant 0.000000e+00 : f32
    %62 = vector.broadcast %cst_38 : f32 to vector<2x32xf32>
    %63 = arith.cmpf oge, %61, %62 : vector<2x32xf32>
    %cst_39 = arith.constant 2.000000e-01 : f32
    %64 = vector.broadcast %cst_39 : f32 to vector<2x32xf32>
    %65 = arith.mulf %64, %61 : vector<2x32xf32>
    %66 = arith.select %63, %61, %65 : vector<2x32xi1>, vector<2x32xf32>
    %c0_40 = arith.constant 0 : index
    %c0_41 = arith.constant 0 : index
    %67 = vector.load %arg4[%c0_40, %c0_41] : memref<2x32xf32, #tpu.memory_space<vmem>>, vector<2x32xf32>
    tpu.vector_store %arg4[%c0_40, %c0_41], %66 {strides = array<i32>} : memref<2x32xf32, #tpu.memory_space<vmem>>, vector<2x32xf32>,
    return
  }
  func.func @transform_0(%arg0: i32) -> (i32, i32) {
    %c0_i32 = arith.constant 0 : i32
    %c0_i32_0 = arith.constant 0 : i32
    return %arg0, %c0_i32 : i32, i32
  }
  func.func @transform_1(%arg0: i32) -> (i32, i32, i32) {
    %c0_i32 = arith.constant 0 : i32
    %c0_i32_0 = arith.constant 0 : i32
    %c0_i32_1 = arith.constant 0 : i32
    %c0_i32_2 = arith.constant 0 : i32
    return %c0_i32, %c0_i32_0, %c0_i32_1 : i32, i32, i32
  }
  func.func @transform_2(%arg0: i32) -> (i32, i32, i32) {
    %c0_i32 = arith.constant 0 : i32
    %c0_i32_0 = arith.constant 0 : i32
    %c0_i32_1 = arith.constant 0 : i32
    %c0_i32_2 = arith.constant 0 : i32
    return %c0_i32, %c0_i32_0, %c0_i32_1 : i32, i32, i32
  }
  func.func @transform_3(%arg0: i32) -> (i32, i32) {
    %c0_i32 = arith.constant 0 : i32
    %c0_i32_0 = arith.constant 0 : i32
    return %arg0, %c0_i32 : i32, i32
  }
}

</mosaic_0001>

<bundles_post_ra>
// kernel: tpu_custom_call.1
= control target key start
LH: loop header
LB: loop body
LE: loop exit
PB: predicated region body
PF: predicated region fallthrough
CT: control target
= control target key end

     0   :  { %8 = vsyncpa [#allocation3], 0  ;;  %s426_s0 = inlined_call_operand.hbm [shape: f32[2,32], index: 0, kind: input, shape index: {}]   ;;  %s427_s1 = inlined_call_operand.hbm [shape: f32[4,32,32], index: 1, kind: input, shape index: {}]   ;;  %s428_s2 = inlined_call_operand.hbm [shape: f32[4,1,32], index: 2, kind: input, shape index: {}]   ;;  %s429_s3 = inlined_call_operand.hbm [shape: f32[2,32], index: 3, kind: output, shape index: {}]  }
   0x1   :  { %9 = vsyncpa [#allocation6], 0  ;;  %s26_s14 = sshll.u32 %s427_s1, 4  ;;  %s27_s14 = int_to_ptr.hbm [resolvable:$true] %s26_s14 }
   0x2   :  { %10 = vsyncpa [#allocation4], 0  ;;  %s379_s15 = smov [#allocation5]   ;;  %s16_s19 = sshll.u32 %s426_s0, 4  ;;  %s17_s19 = int_to_ptr.hbm [resolvable:$true] %s16_s19 }
   0x3   :  { %s28_s16 = sshll.u32 %s379_s15, 4  ;;  %s380_s20 = smov 128   ;;  %s29_s16 = int_to_ptr.vmem [resolvable:$true] %s28_s16 }
   0x4   :  { %s381_s21 = smov 8   ;;  %s382_s22 = smov [#allocation2]  }
   0x5   :  { %34 = dma.hbm_to_vmem [thread:$0]  %s27_s14, 2048, %s29_s16, [#allocation6], %s380_s20, %s380_s20, %s381_s21  }
   0x6   :  { %s18_s23 = sshll.u32 %s382_s22, 4  ;;  %s39_s26 = sshll.u32 %s428_s2, 4  ;;  %s19_s23 = int_to_ptr.vmem [resolvable:$true] %s18_s23  ;;  %s40_s26 = int_to_ptr.hbm [resolvable:$true] %s39_s26 }
   0x7   :  { %21 = dma.hbm_to_vmem [thread:$0]  %s17_s19, 32, %s19_s23, [#allocation3]  }
   0x8   :  { %s383_s1 = smov [#allocation7]   ;;  %s384_s28 = smov 16  }
   0x9   :  { %s41_s27 = sshll.u32 %s383_s1, 4  ;;  %s385_s29 = smov 1   ;;  %s42_s27 = int_to_ptr.vmem [resolvable:$true] %s41_s27 }
   0xa   :  { %47 = dma.hbm_to_vmem [thread:$0]  %s40_s26, 64, %s42_s27, [#allocation6], %s384_s28, %s384_s28, %s385_s29  }
   0xb   :  { %373 = dma.done.wait [#allocation3], 32  }
   0xc   :  { %374 = vsyncadd [#allocation3], 4294967264 }
   0xd   :  { %375 = dma.done.wait [#allocation6], 2112  }
   0xe   :  { %376 = vsyncadd [#allocation6], 4294965184  ;;  %vm62_vm0 = vcmask 254976   ;;  %v60_v0 = vld [vmem:[#allocation2] sm:$0x3]  ;;  %v386_v3 = vmov 32.0  }
   0xf   :  { %v61_v1 = vmul.f32 %v60_v0, %v60_v0  ;;  %273 = vrcp.f32 %v386_v3  ;;  %v89_v6 = vld [vmem:[#allocation5 + $0x18] sm:$0xff]  ;;  %v88_v8 = vld [vmem:[#allocation5 + $0x10] sm:$0xff]  ;;  %v87_v9 = vld [vmem:[#allocation5 + $0x8] sm:$0xff]  ;;  %vm91_vm5 = vcmask 261120   ;;  %s387_s0 = smov [#allocation8]   ;;  %s245_s5 = sshll.u32 %s429_s3, 4  ;;  %s246_s5 = int_to_ptr.hbm [resolvable:$true] %s245_s5 }
  0x10   :  { %107 = vmatpush.msra.mxu0 %v89_v6  ;;  %v86_v10 = vld [vmem:[#allocation5] sm:$0xff]  ;;  %v127_v25 = vld [vmem:[#allocation5 + $0x38] sm:$0xff]  ;;  %v126_v26 = vld [vmem:[#allocation5 + $0x30] sm:$0xff]  ;;  %s243_s2 = sshll.u32 %s387_s0, 4  ;;  %s244_s2 = int_to_ptr.vmem [resolvable:$true] %s243_s2 }
  0x11   :  { %v63_v2 = vsel %vm62_vm0, %v61_v1, 0.0  ;;  %145 = vmatpush.msra.mxu1 %v127_v25  ;;  %v125_v27 = vld [vmem:[#allocation5 + $0x28] sm:$0xff]  ;;  %v124_v28 = vld [vmem:[#allocation5 + $0x20] sm:$0xff]  ;;  %v165_v35 = vld [vmem:[#allocation5 + $0x58] sm:$0xff] }
  0x12   :  { %64 = vadd.xlane.f32.xlu0 %v63_v2  ;;  %108 = vmatpush.msra.mxu0 %v88_v8  ;;  %v269_v29 = vld [vmem:[#allocation7] ss:$0 sm:$0xff]  ;;  %v164_v36 = vld [vmem:[#allocation5 + $0x50] sm:$0xff]  ;;  %v163_v37 = vld [vmem:[#allocation5 + $0x48] sm:$0xff] }
  0x13   :  { %146 = vmatpush.msra.mxu1 %v126_v26  ;;  %183 = vmatpush.msra.mxu2 %v165_v35  ;;  %v162_v38 = vld [vmem:[#allocation5 + $0x40] sm:$0xff]  ;;  %v203_v45 = vld [vmem:[#allocation5 + $0x78] sm:$0xff]  ;;  %v202_v46 = vld [vmem:[#allocation5 + $0x70] sm:$0xff] }
  0x14   :  { %109 = vmatpush.msra.mxu0 %v87_v9  ;;  %v270_v39 = vld [vmem:[#allocation7 + $0x1] ss:$0 sm:$0xff]  ;;  %221 = vmatpush.msra.mxu3 %v203_v45  ;;  %v201_v47 = vld [vmem:[#allocation5 + $0x68] sm:$0xff]  ;;  %v271_v49 = vld [vmem:[#allocation7 + $0x2] ss:$0 sm:$0xff] }
  0x15   :  { %v274_v4 = vpop.eup %273  ;;  %147 = vmatpush.msra.mxu1 %v125_v27  ;;  %184 = vmatpush.msra.mxu2 %v164_v36  ;;  %v200_v48 = vld [vmem:[#allocation5 + $0x60] sm:$0xff] }
  0x16   :  { %v67_v5 = vmul.f32 32.0, %v274_v4  ;;  %110 = vmatpush.msra.mxu0 %v86_v10  ;;  %vm71_vm1 = vweird.f32 %v274_v4  ;;  %222 = vmatpush.msra.mxu3 %v202_v46  ;;  %v272_v55 = vld [vmem:[#allocation7 + $0x3] ss:$0 sm:$0xff] }
  0x17   :  { %148 = vmatpush.msra.mxu1 %v124_v28  ;;  %185 = vmatpush.msra.mxu2 %v163_v37 }
  0x18   :  { %v68_v7 = vsub.f32 1.0, %v67_v5  ;;  %223 = vmatpush.msra.mxu3 %v201_v47 }
  0x19   :  { %186 = vmatpush.msra.mxu2 %v162_v38 }
  0x1a   :  { %v69_v11 = vmul.f32 %v274_v4, %v68_v7  ;;  %224 = vmatpush.msra.mxu3 %v200_v48 }
  0x1c   :  { %v70_v12 = vadd.f32 %v274_v4, %v69_v11 }
  0x1e   :  { %v72_v13 = vsel %vm71_vm1, %v274_v4, %v70_v12 }
  0x85   :  { %v65_v14 = vpop.xlane.xlu0 %64 }
  0x86   :  { %v73_v15 = vmul.f32 %v72_v13, %v65_v14 }
  0x88   :  { %v74_v16 = vadd.f32 1e-08, %v73_v15 }
  0x8a   :  { %275 = vrsqrt.f32 %v74_v16  ;;  %vm81_vm3 = vweird.f32 %v74_v16 }
  0x90   :  { %v276_v17 = vpop.eup %275 }
  0x91   :  { %v76_v18 = vmul.f32 %v276_v17, %v74_v16  ;;  %vm82_vm2 = vweird.f32 %v276_v17 }
  0x92   :  { %vm83_vm4 = vmor %vm81_vm3, %vm82_vm2 }
  0x93   :  { %v77_v19 = vmul.f32 %v276_v17, %v76_v18 }
  0x95   :  { %v78_v20 = vmul.f32 0.5, %v77_v19 }
  0x97   :  { %v79_v21 = vsub.f32 1.5, %v78_v20 }
  0x99   :  { %v80_v22 = vmul.f32 %v276_v17, %v79_v21 }
  0x9b   :  { %v84_v23 = vsel %vm83_vm4, %v276_v17, %v80_v22 }
  0x9c   :  { %v85_v24 = vmul.f32 %v84_v23, %v60_v0 }
  0x9e   :  { %256 = vmatmul.msk.f32.vlgmr.msra.gmra.mxu0 %vm91_vm5, %v85_v24 }
 0x11b   :  { %v112_v30 = vpop.f32.mrf.mxu0 }
 0x11c   :  { %v115_v31 = vmul.f32 0.25, %v112_v30 }
 0x11e   :  { %v119_v32 = vadd.f32 %v269_v29, %v115_v31 }
 0x120   :  { %vm120_vm6 = vcmp.ge.f32.partialorder %v119_v32, 0.0  ;;  %v121_v33 = vmul.f32 0.2, %v119_v32 }
 0x122   :  { %v122_v34 = vsel %vm120_vm6, %v119_v32, %v121_v33 }
 0x123   :  { %257 = vmatmul.msk.f32.vlgmr.msra.gmra.mxu1 %vm91_vm5, %v122_v34 }
 0x1a0   :  { %v150_v40 = vpop.f32.mrf.mxu1 }
 0x1a1   :  { %v153_v41 = vmul.f32 0.25, %v150_v40 }
 0x1a3   :  { %v157_v42 = vadd.f32 %v270_v39, %v153_v41 }
 0x1a5   :  { %vm158_vm7 = vcmp.ge.f32.partialorder %v157_v42, 0.0  ;;  %v159_v43 = vmul.f32 0.2, %v157_v42 }
 0x1a7   :  { %v160_v44 = vsel %vm158_vm7, %v157_v42, %v159_v43 }
 0x1a8   :  { %258 = vmatmul.msk.f32.vlgmr.msra.gmra.mxu2 %vm91_vm5, %v160_v44 }
 0x22b   :  { %v188_v50 = vpop.f32.mrf.mxu2 }
 0x22c   :  { %v191_v51 = vmul.f32 0.25, %v188_v50 }
 0x22e   :  { %v195_v52 = vadd.f32 %v271_v49, %v191_v51 }
 0x230   :  { %vm196_vm8 = vcmp.ge.f32.partialorder %v195_v52, 0.0  ;;  %v197_v53 = vmul.f32 0.2, %v195_v52 }
 0x232   :  { %v198_v54 = vsel %vm196_vm8, %v195_v52, %v197_v53 }
 0x233   :  { %259 = vmatmul.msk.f32.vlgmr.msra.gmra.mxu3 %vm91_vm5, %v198_v54 }
 0x2b6   :  { %v226_v56 = vpop.f32.mrf.mxu3 }
 0x2b7   :  { %v229_v57 = vmul.f32 0.25, %v226_v56 }
 0x2b9   :  { %v233_v58 = vadd.f32 %v272_v55, %v229_v57 }
 0x2bb   :  { %vm234_vm9 = vcmp.ge.f32.partialorder %v233_v58, 0.0  ;;  %v235_v59 = vmul.f32 0.2, %v233_v58 }
 0x2bd   :  { %v236_v60 = vsel %vm234_vm9, %v233_v58, %v235_v59 }
 0x2be   :  { %237 = vst.msk [vmem:[#allocation8] sm:$0x3] %vm62_vm0, %v236_v60 }
 0x2bf   :  { %248 = dma.vmem_to_hbm [thread:$0]  %s244_s2, 32, %s246_s5, [#allocation4]  }
 0x2c0   :  { %377 = dma.done.wait [#allocation4], 32  }
 0x2c1   :  { %378 = vsyncadd [#allocation4], 4294967264 }
 0x2c2   :  { %253 = vsyncpa [#allocation3], 1 }
 0x2c3   :  { %254 = vsyncpa [#allocation6], 1 }
 0x2c4   :  { %255 = vsyncpa [#allocation4], 1 }

</bundles_post_ra>
